<compile_context>
chip_gen: v7x
topology: tpu7x:2x2x1
jax: 0.10.0
libtpu: 0.0.40
codegen_flags: <defaults>
</compile_context>

<pallas_src>
import jax
import jax.numpy as jnp
from jax import lax
from jax.experimental import pallas as pl
from jax.experimental.pallas import tpu as pltpu


def mf_kernel(user_ref, movie_ref, ids_ref, meta_ref, w_ref, b_ref, o_ref):
    """Fused fc_user + metadata gather + elementwise-mul + reduce, one batch tile.

    user_ref  [T, E]        user latent factors
    movie_ref [T, E]        movie latent factors
    ids_ref   [T, 4] int32  row ids into the stacked projected metadata table
    meta_ref  [NR, E]       stacked (gender|age|occupation|zip) tables, each
                            pre-projected through its fc_user weight slice (resident)
    w_ref     [E, E]        fc_user weight rows for the user-latent slice (resident)
    b_ref     [1, E]        fc_user bias (resident)
    o_ref     [1, 8, T//8]  predictions for this tile (lane-dense (8,128) layout)
    """
    T = user_ref.shape[0]
    NR = meta_ref.shape[0]

    # user-latent slice of fc_user on the MXU.
    acc = jnp.dot(user_ref[...], w_ref[...], preferred_element_type=jnp.float32)

    # Fused metadata gather: a multi-hot [T, NR] picks the 4 pre-projected rows
    # per example; their sum (== gather + partial matmuls) falls out of a single
    # MXU contraction.
    ids = ids_ref[...]                                           # [T, 4] int32
    iota = lax.broadcasted_iota(jnp.int32, (T, NR), 1)
    hit = ((iota == ids[:, 0:1]) | (iota == ids[:, 1:2]) |
           (iota == ids[:, 2:3]) | (iota == ids[:, 3:4]))
    acc += jnp.dot(hit.astype(jnp.float32), meta_ref[...],
                   preferred_element_type=jnp.float32)
    acc += b_ref[...]                                            # dropout = identity (eval)

    prod = acc * movie_ref[...]                                  # [T, E]
    o_ref[...] = jnp.sum(prod, axis=-1).reshape(o_ref.shape)     # [1, 8, T//8]


def _pick_tile_b(batch):
    if batch <= 1024:
        return max(8, ((batch + 7) // 8) * 8)   # single tile (demo / small batches)
    if batch <= 4096:
        return 1024                              # nb >= 2: both v7x TCs get work
    return 2048                                  # amortize per-grid-step overhead


def matrix_factorization_forward(params, user_id, movie_id, gender, age,
                                 occupation, zip_code, *, tile_b=None):
    B = user_id.shape[0]
    E = params["user_emb"].shape[-1]
    M = params["gender_emb"].shape[-1]

    if tile_b is None:
        tile_b = _pick_tile_b(B)
    tile_b = max(8, ((tile_b + 7) // 8) * 8)
    nb = -(-B // tile_b)
    b_pad = nb * tile_b

    def pad_idx(idx):
        return idx if b_pad == B else jnp.pad(idx, (0, b_pad - B))

    user_id, movie_id = pad_idx(user_id), pad_idx(movie_id)
    gender, age = pad_idx(gender), pad_idx(age)
    occupation, zip_code = pad_idx(occupation), pad_idx(zip_code)

    # Big-table gathers stay in plain JAX (glue).
    user_latent = params["user_emb"][user_id]       # [Bp, E] f32
    movie_latent = params["movie_emb"][movie_id]    # [Bp, E] f32

    # Pre-project each tiny metadata table through its slice of fc_user's weight
    # (exact: row-gather commutes with the matmul) and stack them, so the kernel
    # replaces 4 lane-sparse gathers + partial matmuls with one multi-hot matmul.
    w = params["fc_w"]                              # [E + 4M, E], stored [in, out]
    meta_tables = (params["gender_emb"], params["age_emb"],
                   params["occ_emb"], params["zip_emb"])
    projected, row_offsets = [], []
    off_in, off_row = E, 0
    for tbl in meta_tables:
        projected.append(tbl @ w[off_in:off_in + M, :])
        row_offsets.append(off_row)
        off_in += M
        off_row += tbl.shape[0]
    meta_table = jnp.concatenate(projected, axis=0)  # [NR, E]
    nr = meta_table.shape[0]
    nr_pad = ((nr + 7) // 8) * 8
    if nr_pad != nr:
        meta_table = jnp.pad(meta_table, ((0, nr_pad - nr), (0, 0)))

    ids = jnp.stack([gender + row_offsets[0], age + row_offsets[1],
                     occupation + row_offsets[2], zip_code + row_offsets[3]],
                    axis=-1).astype(jnp.int32)       # [Bp, 4]

    w_user = w[:E, :]                                # [E, E]
    bias = params["fc_b"].reshape(1, E)              # [1, E]

    row = lambda i: (i, 0)
    const = lambda i: (0, 0)

    out = pl.pallas_call(
        mf_kernel,
        out_shape=jax.ShapeDtypeStruct((nb, 8, tile_b // 8), jnp.float32),
        grid=(nb,),
        in_specs=[
            pl.BlockSpec((tile_b, E), row),        # user latent
            pl.BlockSpec((tile_b, E), row),        # movie latent
            pl.BlockSpec((tile_b, 4), row),        # packed metadata ids
            pl.BlockSpec((nr_pad, E), const),      # projected metadata table (resident)
            pl.BlockSpec((E, E), const),           # fc_user weight, user slice (resident)
            pl.BlockSpec((1, E), const),           # fc_user bias (resident)
        ],
        out_specs=pl.BlockSpec((1, 8, tile_b // 8), lambda i: (i, 0, 0)),
        compiler_params=pltpu.CompilerParams(
            dimension_semantics=("parallel",)),     # megacore-shard batch (v7x)
    )(user_latent, movie_latent, ids, meta_table, w_user, bias)

    return out.reshape(b_pad)[:B]                    # [B]


def reference_forward(params, user_id, movie_id, gender, age, occupation,
                      zip_code):
    """Pure-JAX reference (eval-mode dropout = identity)."""
    x = jnp.concatenate(
        [params["user_emb"][user_id], params["gender_emb"][gender],
         params["age_emb"][age], params["occ_emb"][occupation],
         params["zip_emb"][zip_code]], axis=-1)
    h = x @ params["fc_w"] + params["fc_b"]
    return jnp.sum(h * params["movie_emb"][movie_id], axis=-1)


def init_params(key, n_users, n_movies, n_genders=2, n_ages=7,
                n_occupations=21, n_zip_codes=100, embedding_dim=32,
                metadata_dim=8):
    keys = jax.random.split(key, 8)
    F = embedding_dim + 4 * metadata_dim
    # nn.Embedding default init: N(0, 1). nn.Linear: uniform(-1/sqrt(F), 1/sqrt(F)).
    bound = 1.0 / jnp.sqrt(jnp.float32(F))
    return {
        "user_emb": jax.random.normal(keys[0], (n_users, embedding_dim), jnp.float32),
        "movie_emb": jax.random.normal(keys[1], (n_movies, embedding_dim), jnp.float32),
        "gender_emb": jax.random.normal(keys[2], (n_genders, metadata_dim), jnp.float32),
        "age_emb": jax.random.normal(keys[3], (n_ages, metadata_dim), jnp.float32),
        "occ_emb": jax.random.normal(keys[4], (n_occupations, metadata_dim), jnp.float32),
        "zip_emb": jax.random.normal(keys[5], (n_zip_codes, metadata_dim), jnp.float32),
        # fc_user weight stored as [in, out] so the kernel does x @ W directly.
        "fc_w": jax.random.uniform(keys[6], (F, embedding_dim), jnp.float32,
                                   minval=-bound, maxval=bound),
        "fc_b": jax.random.uniform(keys[7], (embedding_dim,), jnp.float32,
                                   minval=-bound, maxval=bound),
    }


if __name__ == "__main__":
    key = jax.random.PRNGKey(0)
    pkey, ikey = jax.random.split(key)

    n_users, n_movies = 64, 128
    n_genders, n_ages, n_occupations, n_zip_codes = 2, 7, 21, 100

    params = init_params(pkey, n_users, n_movies, n_genders, n_ages,
                         n_occupations, n_zip_codes)

    def make_inputs(k, batch):
        ks = jax.random.split(k, 6)
        return (jax.random.randint(ks[0], (batch,), 0, n_users),
                jax.random.randint(ks[1], (batch,), 0, n_movies),
                jax.random.randint(ks[2], (batch,), 0, n_genders),
                jax.random.randint(ks[3], (batch,), 0, n_ages),
                jax.random.randint(ks[4], (batch,), 0, n_occupations),
                jax.random.randint(ks[5], (batch,), 0, n_zip_codes))

    k1, k2 = jax.random.split(ikey)

    # Single-tile path (small demo batch).
    inputs_small = make_inputs(k1, 8)
    pred_small = jax.block_until_ready(
        matrix_factorization_forward(params, *inputs_small))
    ref_small = reference_forward(params, *inputs_small)
    assert pred_small.shape == (8,)
    assert jnp.allclose(pred_small, ref_small, atol=1e-4, rtol=1e-4)

    # Multi-tile path (B > tile_b): force a tiny tile so nb = 4 is exercised.
    inputs_multi = make_inputs(k2, 32)
    pred_multi = jax.block_until_ready(
        matrix_factorization_forward(params, *inputs_multi, tile_b=8))
    ref_multi = reference_forward(params, *inputs_multi)
    assert pred_multi.shape == (32,)
    assert jnp.allclose(pred_multi, ref_multi, atol=1e-4, rtol=1e-4)

    print("KERNEL_OK")
</pallas_src>

<mosaic_0001>
module attributes {stable_mosaic.version = 11 : i64} {
  func.func @mf_kernel(%arg0: i32, %arg1: memref<8x32xf32, #tpu.memory_space<vmem>>, %arg2: memref<8x32xf32, #tpu.memory_space<vmem>>, %arg3: memref<8x4xi32, #tpu.memory_space<vmem>>, %arg4: memref<136x32xf32, #tpu.memory_space<vmem>>, %arg5: memref<32x32xf32, #tpu.memory_space<vmem>>, %arg6: memref<1x32xf32, #tpu.memory_space<vmem>>, %arg7: memref<1x8x1xf32, #tpu.memory_space<vmem>>) attributes {dimension_semantics = [#tpu.dimension_semantics<parallel>], iteration_bounds = array<i64: 1>, scalar_prefetch = 0 : i64, scratch_operands = 0 : i64, tpu.core_type = #tpu.core_type<tc>, window_params = [{transform_indices = @transform_0, window_bounds = array<i64: 8, 32>}, {transform_indices = @transform_1, window_bounds = array<i64: 8, 32>}, {transform_indices = @transform_2, window_bounds = array<i64: 8, 4>}, {pipeline_mode = #tpu.pipeline_mode<synchronous>, transform_indices = @transform_3, window_bounds = array<i64: 136, 32>}, {pipeline_mode = #tpu.pipeline_mode<synchronous>, transform_indices = @transform_4, window_bounds = array<i64: 32, 32>}, {pipeline_mode = #tpu.pipeline_mode<synchronous>, transform_indices = @transform_5, window_bounds = array<i64: 1, 32>}, {transform_indices = @transform_6, window_bounds = array<i64: 1, 8, 1>}]} {
    %c0 = arith.constant 0 : index
    %c0_0 = arith.constant 0 : index
    %0 = vector.load %arg1[%c0, %c0_0] : memref<8x32xf32, #tpu.memory_space<vmem>>, vector<8x32xf32>
    %c0_1 = arith.constant 0 : index
    %c0_2 = arith.constant 0 : index
    %1 = vector.load %arg5[%c0_1, %c0_2] : memref<32x32xf32, #tpu.memory_space<vmem>>, vector<32x32xf32>
    %cst = arith.constant dense<0.000000e+00> : vector<8x32xf32>
    %2 = tpu.matmul %0, %1, %cst {dimension_numbers = #tpu.dot_dimension_numbers<[1], [0], [0], [1], [0, 0, 1, 1], [], []>} : vector<8x32xf32>, vector<32x32xf32>, vector<8x32xf32> -> vector<8x32xf32>
    %c0_3 = arith.constant 0 : index
    %c0_4 = arith.constant 0 : index
    %3 = vector.load %arg3[%c0_3, %c0_4] : memref<8x4xi32, #tpu.memory_space<vmem>>, vector<8x4xi32>
    %4 = tpu.iota {dimensions = array<i32: 1>} : vector<8x136xi32>
    %5 = vector.extract_strided_slice %3 {offsets = [0, 0], sizes = [8, 1], strides = [1, 1]} : vector<8x4xi32> to vector<8x1xi32>
    %6 = vector.broadcast %5 : vector<8x1xi32> to vector<8x136xi32>
    %7 = arith.cmpi eq, %4, %6 : vector<8x136xi32>
    %8 = vector.extract_strided_slice %3 {offsets = [0, 1], sizes = [8, 1], strides = [1, 1]} : vector<8x4xi32> to vector<8x1xi32>
    %9 = vector.broadcast %8 : vector<8x1xi32> to vector<8x136xi32>
    %10 = arith.cmpi eq, %4, %9 : vector<8x136xi32>
    %11 = arith.ori %7, %10 : vector<8x136xi1>
    %12 = vector.extract_strided_slice %3 {offsets = [0, 2], sizes = [8, 1], strides = [1, 1]} : vector<8x4xi32> to vector<8x1xi32>
    %13 = vector.broadcast %12 : vector<8x1xi32> to vector<8x136xi32>
    %14 = arith.cmpi eq, %4, %13 : vector<8x136xi32>
    %15 = arith.ori %11, %14 : vector<8x136xi1>
    %16 = vector.extract_strided_slice %3 {offsets = [0, 3], sizes = [8, 1], strides = [1, 1]} : vector<8x4xi32> to vector<8x1xi32>
    %17 = vector.broadcast %16 : vector<8x1xi32> to vector<8x136xi32>
    %18 = arith.cmpi eq, %4, %17 : vector<8x136xi32>
    %19 = arith.ori %15, %18 : vector<8x136xi1>
    %20 = arith.extui %19 : vector<8x136xi1> to vector<8x136xi32>
    %21 = arith.sitofp %20 : vector<8x136xi32> to vector<8x136xf32>
    %c0_5 = arith.constant 0 : index
    %c0_6 = arith.constant 0 : index
    %22 = vector.load %arg4[%c0_5, %c0_6] : memref<136x32xf32, #tpu.memory_space<vmem>>, vector<136x32xf32>
    %cst_7 = arith.constant dense<0.000000e+00> : vector<8x32xf32>
    %23 = tpu.matmul %21, %22, %cst_7 {dimension_numbers = #tpu.dot_dimension_numbers<[1], [0], [0], [1], [0, 0, 1, 1], [], []>} : vector<8x136xf32>, vector<136x32xf32>, vector<8x32xf32> -> vector<8x32xf32>
    %24 = arith.addf %2, %23 : vector<8x32xf32>
    %c0_8 = arith.constant 0 : index
    %c0_9 = arith.constant 0 : index
    %25 = vector.load %arg6[%c0_8, %c0_9] : memref<1x32xf32, #tpu.memory_space<vmem>>, vector<1x32xf32>
    %26 = vector.broadcast %25 : vector<1x32xf32> to vector<8x32xf32>
    %27 = arith.addf %24, %26 : vector<8x32xf32>
    %c0_10 = arith.constant 0 : index
    %c0_11 = arith.constant 0 : index
    %28 = vector.load %arg2[%c0_10, %c0_11] : memref<8x32xf32, #tpu.memory_space<vmem>>, vector<8x32xf32>
    %29 = arith.mulf %27, %28 : vector<8x32xf32>
    %cst_12 = arith.constant dense<0.000000e+00> : vector<8xf32>
    %30 = vector.multi_reduction <add>, %29, %cst_12 [1] : vector<8x32xf32> to vector<8xf32>
    %31 = vector.shape_cast %30 : vector<8xf32> to vector<1x8x1xf32>
    %c0_13 = arith.constant 0 : index
    %c0_14 = arith.constant 0 : index
    %c0_15 = arith.constant 0 : index
    %32 = vector.load %arg7[%c0_13, %c0_14, %c0_15] : memref<1x8x1xf32, #tpu.memory_space<vmem>>, vector<1x8x1xf32>
    tpu.vector_store %arg7[%c0_13, %c0_14, %c0_15], %31 {strides = array<i32>} : memref<1x8x1xf32, #tpu.memory_space<vmem>>, vector<1x8x1xf32>,
    return
  }
  func.func @transform_0(%arg0: i32) -> (i32, i32) {
    %c0_i32 = arith.constant 0 : i32
    %c0_i32_0 = arith.constant 0 : i32
    return %arg0, %c0_i32 : i32, i32
  }
  func.func @transform_1(%arg0: i32) -> (i32, i32) {
    %c0_i32 = arith.constant 0 : i32
    %c0_i32_0 = arith.constant 0 : i32
    return %arg0, %c0_i32 : i32, i32
  }
  func.func @transform_2(%arg0: i32) -> (i32, i32) {
    %c0_i32 = arith.constant 0 : i32
    %c0_i32_0 = arith.constant 0 : i32
    return %arg0, %c0_i32 : i32, i32
  }
  func.func @transform_3(%arg0: i32) -> (i32, i32) {
    %c0_i32 = arith.constant 0 : i32
    %c0_i32_0 = arith.constant 0 : i32
    %c0_i32_1 = arith.constant 0 : i32
    return %c0_i32, %c0_i32_0 : i32, i32
  }
  func.func @transform_4(%arg0: i32) -> (i32, i32) {
    %c0_i32 = arith.constant 0 : i32
    %c0_i32_0 = arith.constant 0 : i32
    %c0_i32_1 = arith.constant 0 : i32
    return %c0_i32, %c0_i32_0 : i32, i32
  }
  func.func @transform_5(%arg0: i32) -> (i32, i32) {
    %c0_i32 = arith.constant 0 : i32
    %c0_i32_0 = arith.constant 0 : i32
    %c0_i32_1 = arith.constant 0 : i32
    return %c0_i32, %c0_i32_0 : i32, i32
  }
  func.func @transform_6(%arg0: i32) -> (i32, i32, i32) {
    %c0_i32 = arith.constant 0 : i32
    %c0_i32_0 = arith.constant 0 : i32
    %c0_i32_1 = arith.constant 0 : i32
    return %arg0, %c0_i32, %c0_i32_0 : i32, i32, i32
  }
}

</mosaic_0001>

<bundles_post_ra>
// kernel: tpu_custom_call.1
= control target key start
LH: loop header
LB: loop body
LE: loop exit
PB: predicated region body
PF: predicated region fallthrough
CT: control target
= control target key end

     0   :  { %v311_v0 = vmov 0   ;;  %v312_v2 = vmov 2   ;;  %v313_v8 = vmov 0.0|0.0   ;;  %v314_v12 = vmov 1   ;;  %s434_s2 = inlined_call_operand.vmem [shape: s32[8,4], index: 2, kind: input, shape index: {}]   ;;  %s435_s3 = inlined_call_operand.vmem [shape: f32[136,32], index: 3, kind: input, shape index: {}]   ;;  %s436_s4 = inlined_call_operand.vmem [shape: f32[32,32], index: 4, kind: input, shape index: {}]   ;;  %s437_s0 = inlined_call_operand.vmem [shape: f32[8,32], index: 0, kind: input, shape index: {}]   ;;  %s438_s5 = inlined_call_operand.vmem [shape: f32[1,32], index: 5, kind: input, shape index: {}]   ;;  %s439_s1 = inlined_call_operand.vmem [shape: f32[8,32], index: 1, kind: input, shape index: {}]   ;;  %s440_s6 = inlined_call_operand.vmem [shape: f32[1,8,1], index: 6, kind: output, shape index: {}]  }
   0x1   :  { %306 = vset.pattern.permute.xlu0 %v311_v0  ;;  %v28_v1 = vld [vmem:[%s434_s2] sm:$0xff]  ;;  %308 = vset.pattern.permute.xlu1 %v312_v2  ;;  %v63_v4 = vld [vmem:[%s435_s3 + $0x8] sm:$0xff]  ;;  %v64_v6 = vld [vmem:[%s435_s3 + $0x10] sm:$0xff]  ;;  %v315_v13 = vmov 3   ;;  %vm316_vm0 = vmmov 0   ;;  %v317_v24 = vmov 0.0   ;;  %v29_v39 = vlaneseq }
   0x2   :  { %v62_v3 = vld [vmem:[%s435_s3] sm:$0xff]  ;;  %33 = vperm.xlu0 %306, %v28_v1   ;;  %45 = vperm.xlu1 %308, %v28_v1   ;;  %v65_v7 = vld [vmem:[%s435_s3 + $0x18] sm:$0xff]  ;;  %v67_v11 = vld [vmem:[%s435_s3 + $0x28] sm:$0xff]  ;;  %vm153_vm1 = vcmask 261120   ;;  %vm79_vm14 = vcmask 64512   ;;  %v318_v47 = vmov 1.0  }
   0x3   :  { %v269_v5 = vpack.c.bf16 %v63_v4, %v62_v3  ;;  %268 = vmatprep.subr.bf16.mxu0 %v313_v8  ;;  %292 = vmatprep.subr.bf16.mxu1 %v313_v8  ;;  %v272_v9 = vpack.c.bf16 %v65_v7, %v64_v6  ;;  %v66_v10 = vld [vmem:[%s435_s3 + $0x20] sm:$0xff]  ;;  %v25_v15 = vld [vmem:[%s436_s4 + $0x8] sm:$0xff]  ;;  %v26_v17 = vld [vmem:[%s436_s4 + $0x10] sm:$0xff]  ;;  %v30_v40 = vand.u32 127, %v29_v39 }
   0x4   :  { %v24_v14 = vld [vmem:[%s436_s4] sm:$0xff]  ;;  %v27_v18 = vld [vmem:[%s436_s4 + $0x18] sm:$0xff]  ;;  %v275_v19 = vpack.c.bf16 %v67_v11, %v66_v10  ;;  %v68_v20 = vld [vmem:[%s435_s3 + $0x30] sm:$0xff]  ;;  %265 = vmatprep.mubr.msk.f32.mxu1 %vm316_vm0, %v317_v24 }
   0x5   :  { %270 = vmatpush1.bf16.msra.mxu0 %v269_v5  ;;  %v293_v16 = vpack.c.bf16 %v25_v15, %v24_v14  ;;  %v69_v21 = vld [vmem:[%s435_s3 + $0x38] sm:$0xff]  ;;  %v296_v22 = vpack.c.bf16 %v27_v18, %v26_v17  ;;  %v70_v25 = vld [vmem:[%s435_s3 + $0x40] sm:$0xff]  ;;  %v71_v26 = vld [vmem:[%s435_s3 + $0x48] sm:$0xff]  ;;  %v31_v43 = vadd.s32 128, %v30_v40 }
   0x6   :  { %271 = vmatprep.subr.bf16.mxu0 %v313_v8  ;;  %307 = vset.pattern.permute.xlu0 %v314_v12  ;;  %v278_v23 = vpack.c.bf16 %v69_v21, %v68_v20  ;;  %v23_v27 = vld [vmem:[%s437_s0] sm:$0xff]  ;;  %v281_v28 = vpack.c.bf16 %v71_v26, %v70_v25  ;;  %v72_v29 = vld [vmem:[%s435_s3 + $0x50] sm:$0xff]  ;;  %v73_v30 = vld [vmem:[%s435_s3 + $0x58] sm:$0xff] }
   0x7   :  { %309 = vset.pattern.permute.xlu1 %v315_v13  ;;  %38 = vperm.xlu0 %307, %v28_v1   ;;  %v284_v31 = vpack.c.bf16 %v73_v30, %v72_v29  ;;  %v74_v32 = vld [vmem:[%s435_s3 + $0x60] sm:$0xff]  ;;  %v75_v33 = vld [vmem:[%s435_s3 + $0x68] sm:$0xff]  ;;  %v76_v35 = vld [vmem:[%s435_s3 + $0x70] sm:$0xff] }
   0x8   :  { %52 = vperm.xlu1 %309, %v28_v1   ;;  %294 = vmatpush3.bf16.msra.mxu1 %v293_v16  ;;  %v287_v34 = vpack.c.bf16 %v75_v33, %v74_v32  ;;  %v77_v36 = vld [vmem:[%s435_s3 + $0x78] sm:$0xff]  ;;  %v78_v38 = vld [vmem:[%s435_s3 + $0x80] sm:$0xff] }
   0x9   :  { %273 = vmatpush1.bf16.msra.mxu0 %v272_v9  ;;  %295 = vmatprep.subr.bf16.mxu1 %v313_v8  ;;  %v290_v37 = vpack.c.bf16 %v77_v36, %v76_v35  ;;  %v251_v51 = vld [vmem:[%s438_s5] ss:$0 sm:$0xff] }
   0xa   :  { %274 = vmatprep.subr.bf16.mxu0 %v313_v8  ;;  %v235_v54 = vld [vmem:[%s439_s1] sm:$0xff] }
   0xb   :  { %310 = vset.pattern.permute.xlu0 %v315_v13 }
   0xc   :  { %297 = vmatpush3.bf16.msra.mxu1 %v296_v22 }
   0xd   :  { %276 = vmatpush1.bf16.msra.mxu0 %v275_v19 }
   0xe   :  { %277 = vmatprep.subr.bf16.mxu0 %v313_v8 }
   0xf   :  { %266 = vmatmul.mubr.msk.f32.vlgmr.msra.gmra.mrb[0].mxu1 %vm153_vm1, %v23_v27 }
  0x11   :  { %279 = vmatpush1.bf16.msra.mxu0 %v278_v23 }
  0x12   :  { %280 = vmatprep.subr.bf16.mxu0 %v313_v8 }
  0x15   :  { %282 = vmatpush1.bf16.msra.mxu0 %v281_v28 }
  0x16   :  { %283 = vmatprep.subr.bf16.mxu0 %v313_v8 }
  0x19   :  { %285 = vmatpush1.bf16.msra.mxu0 %v284_v31 }
  0x1a   :  { %286 = vmatprep.subr.bf16.mxu0 %v313_v8 }
  0x1d   :  { %288 = vmatpush1.bf16.msra.mxu0 %v287_v34 }
  0x1e   :  { %289 = vmatprep.subr.bf16.mxu0 %v313_v8 }
  0x21   :  { %291 = vmatpush1.bf16.msra.mxu0 %v290_v37 }
  0x22   :  { %115 = vmatprep.subr.mxu0 %v317_v24 }
  0x25   :  { %116 = vmatpush1.msra.mxu0 %v78_v38 }
  0x81   :  { %v34_v41 = vpop.permute.xlu0 %33  ;;  %v46_v42 = vpop.permute.xlu1 %45 }
  0x82   :  { %vm35_vm2 = vcmp.eq.s32.totalorder %v30_v40, %v34_v41  ;;  %vm36_vm5 = vcmp.eq.s32.totalorder %v31_v43, %v34_v41  ;;  %vm47_vm8 = vcmp.eq.s32.totalorder %v30_v40, %v46_v42  ;;  %vm48_vm10 = vcmp.eq.s32.totalorder %v31_v43, %v46_v42 }
  0x86   :  { %v39_v44 = vpop.permute.xlu0 %38 }
  0x87   :  { %vm40_vm3 = vcmp.eq.s32.totalorder %v30_v40, %v39_v44  ;;  %vm41_vm4 = vcmp.eq.s32.totalorder %v31_v43, %v39_v44  ;;  %v53_v45 = vpop.permute.xlu1 %52 }
  0x88   :  { %vm42_vm6 = vmor %vm35_vm2, %vm40_vm3  ;;  %vm55_vm9 = vcmp.eq.s32.totalorder %v31_v43, %v53_v45  ;;  %vm54_vm12 = vcmp.eq.s32.totalorder %v30_v40, %v53_v45  ;;  %vm240_vm2 = vcmask 7168  }
  0x89   :  { %vm43_vm7 = vmor %vm36_vm5, %vm41_vm4 }
  0x8a   :  { %vm49_vm11 = vmor %vm42_vm6, %vm47_vm8 }
  0x8b   :  { %vm50_vm13 = vmor %vm43_vm7, %vm48_vm10 }
  0x8c   :  { %vm57_vm15 = vmor %vm50_vm13, %vm55_vm9 }
  0x8d   :  { %v247_v46 = vsel %vm57_vm15, 1.0, %v317_v24  ;;  %vm56_vm0 = vmor %vm49_vm11, %vm54_vm12 }
  0x8e   :  { %248 = vmatprep.mubr.msk.f32.mxu0 %vm79_vm14, %v247_v46 }
  0x8f   :  { %249 = vmatmul.mubr.msk.f32.vlgmr.msra.gmra.mrb[0].mxu0 %vm56_vm0, %v318_v47 }
  0xe2   :  { %v223_v48 = vpop.f32.mrb[0].mxu1 }
  0xe3   :  { %v267_v49 = vpop.f32.mrb[1].mxu1 }
 0x162   :  { %v149_v50 = vpop.f32.mrb[0].mxu0 }
 0x163   :  { %v224_v52 = vadd.f32 %v223_v48, %v149_v50  ;;  %v151_v53 = vpop.f32.mrb[1].mxu0 }
 0x165   :  { %v234_v55 = vadd.f32 %v251_v51, %v224_v52 }
 0x167   :  { %v236_v56 = vmul.f32 %v235_v54, %v234_v55 }
 0x169   :  { %v237_v57 = vsel %vm153_vm1, %v236_v56, 0.0 }
 0x16a   :  { %238 = vadd.xlane.f32.xlu1 %v237_v57 }
 0x1f7   :  { %v239_v58 = vpop.xlane.xlu1 %238 }
 0x1f8   :  { %241 = vst.msk [vmem:[%s440_s6] sm:$0xff] %vm240_vm2, %v239_v58 }

</bundles_post_ra>
